<compile_context>
chip_gen: v7x
topology: tpu7x:2x2x1
jax: 0.10.0
libtpu: 0.0.40
codegen_flags: <defaults>
</compile_context>

<pallas_src>
from functools import partial

import jax
import jax.numpy as jnp
from jax import lax
from jax.experimental import pallas as pl
from jax.experimental.pallas import tpu as pltpu


def _round_up(x, m):
    return (x + m - 1) // m * m


# --------------------------------------------------------------------------- #
# Pallas kernel: one EGATConv layer (grid over edge tiles, online softmax)
# --------------------------------------------------------------------------- #
def _egat_conv_kernel(nf_ref, ef_ref, src_ref, dst_ref,
                      w_node_ref, w_fij_ref, bias_ref,
                      attn_ref, mean_e_t_ref, expand_ref, mean_n_ref,
                      hout_ref, fout_t_ref,
                      proj_a, proj_b, m_acc, acc,
                      *, H, Fe, Fn):
    f32 = jnp.float32
    bf16 = jnp.bfloat16
    NEG = f32(-1e30)
    HFe = H * Fe
    HFn = H * Fn
    step = pl.program_id(0)

    # ---- one-time: fused node projection [fc_ni | fc_node_src | fc_nj] ------
    # Computed once in f32 on the MXU, stored bf16 so every per-tile gather
    # matmul against the bf16 one-hots runs in fast bf16 MXU mode.
    @pl.when(step == 0)
    def _init():
        full = jnp.dot(nf_ref[...], w_node_ref[...], preferred_element_type=f32)
        proj_a[...] = full[:, :HFe + HFn].astype(bf16)   # [fc_ni | fc_node_src]
        proj_b[...] = full[:, HFe + HFn:].astype(bf16)   # fc_nj
        m_acc[...] = jnp.full(m_acc.shape, NEG, f32)
        acc[...] = jnp.zeros(acc.shape, f32)

    src = src_ref[...]                                   # (TE, N) bf16 one-hot
    dst = dst_ref[...]                                   # (TE, N) bf16 one-hot
    expand = expand_ref[...]                             # (H, HFn + H) f32

    # ---- fused gathers via one-hot matmuls (bf16 MXU, exact row picks) ------
    g_src = jnp.dot(src, proj_a[...], preferred_element_type=f32)  # (TE, HFe+HFn)
    f_src = g_src[:, :HFe]                               # gathered fc_ni
    h_src = g_src[:, HFe:]                               # gathered fc_node_src
    f_dst = jnp.dot(dst, proj_b[...], preferred_element_type=f32)   # (TE, HFe)
    f_fij = jnp.dot(ef_ref[...], w_fij_ref[...], preferred_element_type=f32)

    f_pre = f_src + f_dst + f_fij + bias_ref[...]        # (TE, HFe) f32
    # DGL EGATConv: F.leaky_relu, default negative_slope = 0.01  (f32 VPU)
    f_out = jnp.where(f_pre >= 0, f_pre, f32(0.01) * f_pre)

    # mean over heads fused into the edge-feature output; produced transposed
    # (Fe, TE) so the per-step store / DMA writeback is lane-dense.
    fout_t = lax.dot_general(mean_e_t_ref[...], f_out,
                             (((1,), (1,)), ((), ())),
                             preferred_element_type=f32)            # (Fe, TE)
    fout_t_ref[...] = fout_t.astype(fout_t_ref.dtype)

    # attention scores, all heads at once (block-diagonal attention weights)
    scores = jnp.dot(f_out, attn_ref[...], preferred_element_type=f32)  # (TE, H)

    # ---- online softmax with a per-head running SCALAR reference ------------
    # Any reference >= the tile scores is valid flash-softmax math; using the
    # per-head tile max removes the (TE, N) masked-max temporaries and the
    # per-destination max gather matmul entirely.
    m_old = m_acc[...]                                                # (1, H)
    m_new = jnp.maximum(m_old, jnp.max(scores, axis=0, keepdims=True))
    m_acc[...] = m_new
    alpha = jnp.exp(m_old - m_new)                                    # (1, H)
    p = jnp.exp(scores - m_new)                                       # (TE, H)

    # expand per-head weights to per-feature lanes and scale the messages
    p_wide = jnp.dot(p, expand[:, :HFn], preferred_element_type=f32)  # (TE, HFn)
    msg_p = jnp.concatenate([p_wide * h_src, p], axis=1).astype(bf16)  # (TE, HFn+H)

    # ONE fused scatter matmul over the big dst operand: [numerator | denom]
    scat = lax.dot_general(dst, msg_p, (((0,), (0,)), ((), ())),
                           preferred_element_type=f32)                # (N, HFn+H)
    # per-head scalar rescale, broadcast over rows (no (N, HFn) matmul)
    alpha_full = jnp.dot(alpha, expand, preferred_element_type=f32)   # (1, HFn+H)
    acc[...] = acc[...] * alpha_full + scat

    # ---- finalize: normalize, mean over heads, single full-width store ------
    @pl.when(step == pl.num_programs(0) - 1)
    def _finalize():
        acc_v = acc[...]
        num = acc_v[:, :HFn]                                          # (N, HFn)
        den = acc_v[:, HFn:]                                          # (N, H)
        # empty / padded destinations have den == 0 and num == 0 -> output 0,
        # and the guarded reciprocal can never produce inf/NaN.
        inv = pl.reciprocal(jnp.where(den > 0, den, f32(1.0)), approx=True)
        inv_wide = jnp.dot(inv, expand_ref[...][:, :HFn],
                           preferred_element_type=f32)                # (N, HFn)
        h_full = num * inv_wide
        hout_ref[...] = jnp.dot(h_full, mean_n_ref[...],
                                preferred_element_type=f32).astype(hout_ref.dtype)


# --------------------------------------------------------------------------- #
# Generation-aware tile / VMEM planning
# --------------------------------------------------------------------------- #
def _vmem_plan(E, N_pad, Fin_n, Fin_e, H, Fe, Fn):
    HFe, HFn = H * Fe, H * Fn
    try:
        cap = int(pltpu.get_tpu_info().vmem_capacity_bytes)
    except Exception:
        cap = 64 * 1024 * 1024                    # conservative (v7x-sized)
    vmem_limit = max(32 * 1024 * 1024, min(int(cap * 0.85), 112 * 1024 * 1024))
    budget = int(vmem_limit * 0.70)

    resident = (N_pad * Fin_n * 4                 # node feats (f32, resident)
                + N_pad * (HFe + HFn) * 2         # proj_a scratch (bf16)
                + N_pad * HFe * 2                 # proj_b scratch (bf16)
                + N_pad * (HFn + H) * 4           # fused [num | den] accumulator
                + N_pad * Fn * 4                  # node-output block
                + (2 << 20))                      # weights + compiler slack
    per_edge = (2 * 2 * N_pad * 2                 # src+dst bf16, double-buffered
                + 2 * Fin_e * 4                   # edge-feat tile, double-buffered
                + 2 * Fe * 4                      # edge-output tile, double-buffered
                + 8 * (HFe + HFn))                # in-kernel f32 transients
    te_fit = max((budget - resident) // max(per_edge, 1), 128)

    single_cap = min(te_fit, 2048)
    if E <= single_cap:
        TE = max(16, _round_up(E, 16))            # single edge tile
        E_pad = TE
    else:
        TE = max(128, (int(min(te_fit, 2048)) // 128) * 128)
        E_pad = _round_up(E, TE)
    return TE, E_pad, int(vmem_limit)


# --------------------------------------------------------------------------- #
# Wrapper: one EGATConv layer
# --------------------------------------------------------------------------- #
def egat_conv(nfeats, efeats, src_oh, dst_oh, params, *, H, Fe, Fn,
              out_dtype=jnp.float32):
    f32 = jnp.float32
    N, Fin_n = nfeats.shape
    E, Fin_e = efeats.shape
    HFe, HFn = H * Fe, H * Fn

    N_pad = _round_up(N, 8)
    TE, E_pad, vmem_limit = _vmem_plan(E, N_pad, Fin_n, Fin_e, H, Fe, Fn)

    nf = jnp.zeros((N_pad, Fin_n), f32).at[:N].set(nfeats.astype(f32))
    ef = jnp.zeros((E_pad, Fin_e), f32).at[:E].set(efeats.astype(f32))
    # one-hot incidence in bf16 (0/1 exact): feeds the bf16 MXU directly and
    # halves the HBM/VMEM traffic of the two largest streamed operands.
    # TODO(synk): v6e could use int8 / v7x fp8 one-hots for another 2x; the
    # real fix for large graphs is scalar-prefetched src/dst indices
    # (PrefetchScalarGridSpec) instead of dense incidence.
    src = jnp.zeros((E_pad, N_pad), jnp.bfloat16).at[:E, :N].set(
        src_oh.astype(jnp.bfloat16))
    dst = jnp.zeros((E_pad, N_pad), jnp.bfloat16).at[:E, :N].set(
        dst_oh.astype(jnp.bfloat16))

    # fused node-side weights: [fc_ni | fc_node_src | fc_nj]
    w_node = jnp.concatenate(
        [params["w_ni"], params["w_src"], params["w_nj"]], axis=1)
    w_fij = params["w_fij"]
    bias = params["bias"]
    # block-diagonal attention:   scores = f_out @ attn_bd  -> (TE, H)
    attn_bd = jnp.zeros((HFe, H), f32)
    for h in range(H):
        attn_bd = attn_bd.at[h * Fe:(h + 1) * Fe, h].set(params["attn"][h])
    # pre-transposed head-mean for the lane-dense (Fe, TE) edge-output store
    mean_e_t = jnp.kron(jnp.ones((1, H), f32), jnp.eye(Fe, dtype=f32)) / H  # (Fe, HFe)
    # head -> per-feature-lane expansion, with identity tail so the fused
    # [numerator | denominator] accumulator rescales with one broadcast vector
    expand_full = jnp.concatenate(
        [jnp.kron(jnp.eye(H, dtype=f32), jnp.ones((1, Fn), f32)),
         jnp.eye(H, dtype=f32)], axis=1)                                    # (H, HFn+H)
    mean_n = jnp.kron(jnp.ones((H, 1), f32), jnp.eye(Fn, dtype=f32)) / H    # (HFn, Fn)

    full = lambda a: pl.BlockSpec(a.shape, lambda i: (0,) * a.ndim)
    grid = (E_pad // TE,)

    hout, fout_t = pl.pallas_call(
        partial(_egat_conv_kernel, H=H, Fe=Fe, Fn=Fn),
        out_shape=(jax.ShapeDtypeStruct((N_pad, Fn), out_dtype),
                   jax.ShapeDtypeStruct((Fe, E_pad), out_dtype)),
        grid=grid,
        in_specs=[
            full(nf),                                       # node feats (resident)
            pl.BlockSpec((TE, Fin_e), lambda i: (i, 0)),    # edge feats tile
            pl.BlockSpec((TE, N_pad), lambda i: (i, 0)),    # src one-hot tile (bf16)
            pl.BlockSpec((TE, N_pad), lambda i: (i, 0)),    # dst one-hot tile (bf16)
            full(w_node), full(w_fij), full(bias),
            full(attn_bd), full(mean_e_t), full(expand_full), full(mean_n),
        ],
        out_specs=(pl.BlockSpec((N_pad, Fn), lambda i: (0, 0)),  # node out (resident)
                   pl.BlockSpec((Fe, TE), lambda i: (0, i))),    # edge out (lane-dense)
        scratch_shapes=[
            pltpu.VMEM((N_pad, HFe + HFn), jnp.bfloat16),  # [fc_ni | fc_node_src]
            pltpu.VMEM((N_pad, HFe), jnp.bfloat16),        # fc_nj
            pltpu.VMEM((1, H), jnp.float32),               # running per-head max
            pltpu.VMEM((N_pad, HFn + H), jnp.float32),     # fused [num | den]
        ],
        compiler_params=pltpu.CompilerParams(
            # the edge axis carries the online-softmax accumulators -> sequential
            dimension_semantics=("arbitrary",),
            vmem_limit_bytes=vmem_limit),
    )(nf, ef, src, dst, w_node, w_fij, bias, attn_bd, mean_e_t, expand_full,
      mean_n)

    # TODO(synk): for v7x megacore add a second "parallel" grid axis over
    # destination-node blocks (per-block accumulators / node_proj slices) so
    # the second TensorCore is not idle.
    return hout[:N], fout_t.T[:E]


# --------------------------------------------------------------------------- #
# Parameter init (deterministic, synthetic)
# --------------------------------------------------------------------------- #
def init_egat_params(key, in_n, in_e, out_n, out_e, H):
    ks = jax.random.split(key, 6)
    g = lambda k, shape: 0.1 * jax.random.normal(k, shape, jnp.float32)
    return {
        "w_ni":  g(ks[0], (in_n, H * out_e)),   # fc_ni  (stored pre-transposed)
        "w_nj":  g(ks[1], (in_n, H * out_e)),   # fc_nj
        "w_fij": g(ks[2], (in_e, H * out_e)),   # fc_fij
        "w_src": g(ks[3], (in_n, H * out_n)),   # fc_node_src
        "attn":  g(ks[4], (H, out_e)),          # attn (1,H,Fe) -> (H,Fe)
        "bias":  g(ks[5], (1, H * out_e)),      # bias (H*Fe,) -> (1,H*Fe)
    }


# --------------------------------------------------------------------------- #
# Full EGAT model forward (mean over heads fused into the layer-1 kernel)
# --------------------------------------------------------------------------- #
def egat_forward(nfeats, efeats, src_oh, dst_oh, p1, p2,
                 hid_n, hid_e, out_n, out_e):
    # layer-1 outputs are only an internal hand-off -> bf16 halves the HBM
    # round trip between the two pallas_calls (softmax math stays f32 inside).
    h1, e1 = egat_conv(nfeats, efeats, src_oh, dst_oh, p1,
                       H=3, Fe=hid_e, Fn=hid_n, out_dtype=jnp.bfloat16)
    h2, _ = egat_conv(h1, e1, src_oh, dst_oh, p2,
                      H=1, Fe=out_e, Fn=out_n, out_dtype=jnp.float32)
    return h2[:, None, :]          # (N, 1, out_node_feats), DGL per-head layout


# --------------------------------------------------------------------------- #
# Pure-JAX reference (segment ops, mirrors DGL EGATConv semantics)
# --------------------------------------------------------------------------- #
def _egat_conv_ref(nf, ef, src, dst, p, H, Fe, Fn, N):
    f_ni = nf @ p["w_ni"]
    f_nj = nf @ p["w_nj"]
    f_fij = ef @ p["w_fij"]
    f_pre = f_ni[src] + f_nj[dst] + f_fij + p["bias"][0]
    f_out = jnp.where(f_pre >= 0, f_pre, 0.01 * f_pre)
    f_out3 = f_out.reshape(-1, H, Fe)
    e = jnp.sum(f_out3 * p["attn"][None], axis=-1)                    # (E, H)
    m = jax.ops.segment_max(e, dst, num_segments=N)
    ex = jnp.exp(e - m[dst])
    s = jax.ops.segment_sum(ex, dst, num_segments=N)
    a = ex / s[dst]
    h = (nf @ p["w_src"]).reshape(-1, H, Fn)
    msg = a[:, :, None] * h[src]
    hout = jax.ops.segment_sum(msg, dst, num_segments=N)
    return hout, f_out3


def egat_forward_ref(nf, ef, src, dst, p1, p2, hid_n, hid_e, out_n, out_e, N):
    h1, e1 = _egat_conv_ref(nf, ef, src, dst, p1, 3, hid_e, hid_n, N)
    h1 = jnp.mean(h1, axis=1)
    e1 = jnp.mean(e1, axis=1)
    h2, _ = _egat_conv_ref(h1, e1, src, dst, p2, 1, out_e, out_n, N)
    return h2


# --------------------------------------------------------------------------- #
if __name__ == "__main__":
    key = jax.random.PRNGKey(0)
    N, E = 8, 16
    in_n, in_e = 4, 6
    hid_n, hid_e = 8, 8
    out_n, out_e = 8, 8

    k1, k2, k3, k4, k5, k6 = jax.random.split(key, 6)
    src_idx = jax.random.randint(k1, (E,), 0, N)
    dst_idx = jax.random.randint(k2, (E,), 0, N)
    node_feats = jax.random.normal(k3, (N, in_n), jnp.float32)
    edge_feats = jax.random.normal(k4, (E, in_e), jnp.float32)

    p1 = init_egat_params(k5, in_n, in_e, hid_n, hid_e, 3)
    p2 = init_egat_params(k6, hid_n, hid_e, out_n, out_e, 1)

    src_oh = jax.nn.one_hot(src_idx, N, dtype=jnp.float32)   # (E, N)
    dst_oh = jax.nn.one_hot(dst_idx, N, dtype=jnp.float32)   # (E, N)

    out = egat_forward(node_feats, edge_feats, src_oh, dst_oh, p1, p2,
                       hid_n, hid_e, out_n, out_e)
    out = jax.block_until_ready(out)

    ref = egat_forward_ref(node_feats, edge_feats, src_idx, dst_idx, p1, p2,
                           hid_n, hid_e, out_n, out_e, N)

    assert out.shape == (N, 1, out_n), out.shape
    assert bool(jnp.all(jnp.isfinite(out)))
    out_f32 = out.astype(jnp.float32)
    err = float(jnp.max(jnp.abs(out_f32 - ref)))
    # tolerance accounts for bf16 MXU operands, the bf16 inter-layer hand-off
    # and the approximate (EUP) reciprocal; real bugs produce O(0.1) errors.
    assert bool(jnp.allclose(out_f32, ref, atol=1.5e-2, rtol=5e-2)), err
    print("KERNEL_OK")
</pallas_src>

<mosaic_0001>
module attributes {stable_mosaic.version = 11 : i64} {
  func.func @_egat_conv_kernel(%arg0: i32, %arg1: memref<8x4xf32, #tpu.memory_space<vmem>>, %arg2: memref<16x6xf32, #tpu.memory_space<vmem>>, %arg3: memref<16x8xbf16, #tpu.memory_space<vmem>>, %arg4: memref<16x8xbf16, #tpu.memory_space<vmem>>, %arg5: memref<4x72xf32, #tpu.memory_space<vmem>>, %arg6: memref<6x24xf32, #tpu.memory_space<vmem>>, %arg7: memref<1x24xf32, #tpu.memory_space<vmem>>, %arg8: memref<24x3xf32, #tpu.memory_space<vmem>>, %arg9: memref<8x24xf32, #tpu.memory_space<vmem>>, %arg10: memref<3x27xf32, #tpu.memory_space<vmem>>, %arg11: memref<24x8xf32, #tpu.memory_space<vmem>>, %arg12: memref<8x8xbf16, #tpu.memory_space<vmem>>, %arg13: memref<8x16xbf16, #tpu.memory_space<vmem>>, %arg14: memref<8x48xbf16, #tpu.memory_space<vmem>>, %arg15: memref<8x24xbf16, #tpu.memory_space<vmem>>, %arg16: memref<1x3xf32, #tpu.memory_space<vmem>>, %arg17: memref<8x27xf32, #tpu.memory_space<vmem>>) attributes {dimension_semantics = [#tpu.dimension_semantics<arbitrary>], iteration_bounds = array<i64: 1>, scalar_prefetch = 0 : i64, scratch_operands = 4 : i64, tpu.core_type = #tpu.core_type<tc>, window_params = [{pipeline_mode = #tpu.pipeline_mode<synchronous>, transform_indices = @transform_0, window_bounds = array<i64: 8, 4>}, {transform_indices = @transform_1, window_bounds = array<i64: 16, 6>}, {transform_indices = @transform_2, window_bounds = array<i64: 16, 8>}, {transform_indices = @transform_3, window_bounds = array<i64: 16, 8>}, {pipeline_mode = #tpu.pipeline_mode<synchronous>, transform_indices = @transform_4, window_bounds = array<i64: 4, 72>}, {pipeline_mode = #tpu.pipeline_mode<synchronous>, transform_indices = @transform_5, window_bounds = array<i64: 6, 24>}, {pipeline_mode = #tpu.pipeline_mode<synchronous>, transform_indices = @transform_6, window_bounds = array<i64: 1, 24>}, {pipeline_mode = #tpu.pipeline_mode<synchronous>, transform_indices = @transform_7, window_bounds = array<i64: 24, 3>}, {pipeline_mode = #tpu.pipeline_mode<synchronous>, transform_indices = @transform_8, window_bounds = array<i64: 8, 24>}, {pipeline_mode = #tpu.pipeline_mode<synchronous>, transform_indices = @transform_9, window_bounds = array<i64: 3, 27>}, {pipeline_mode = #tpu.pipeline_mode<synchronous>, transform_indices = @transform_10, window_bounds = array<i64: 24, 8>}, {pipeline_mode = #tpu.pipeline_mode<synchronous>, transform_indices = @transform_11, window_bounds = array<i64: 8, 8>}, {transform_indices = @transform_12, window_bounds = array<i64: 8, 16>}]} {
    %c0_i32 = arith.constant 0 : i32
    %0 = arith.cmpi eq, %arg0, %c0_i32 : i32
    %1 = arith.extui %0 : i1 to i32
    %cst = arith.constant -1.000000e+30 : f32
    %c0_i32_0 = arith.constant 0 : i32
    %2 = arith.cmpi ne, %1, %c0_i32_0 : i32
    scf.if %2 {
      %c0_43 = arith.constant 0 : index
      %c0_44 = arith.constant 0 : index
      %56 = vector.load %arg1[%c0_43, %c0_44] : memref<8x4xf32, #tpu.memory_space<vmem>>, vector<8x4xf32>
      %c0_45 = arith.constant 0 : index
      %c0_46 = arith.constant 0 : index
      %57 = vector.load %arg5[%c0_45, %c0_46] : memref<4x72xf32, #tpu.memory_space<vmem>>, vector<4x72xf32>
      %cst_47 = arith.constant dense<0.000000e+00> : vector<8x72xf32>
      %58 = tpu.matmul %56, %57, %cst_47 {dimension_numbers = #tpu.dot_dimension_numbers<[1], [0], [0], [1], [0, 0, 1, 1], [], []>} : vector<8x4xf32>, vector<4x72xf32>, vector<8x72xf32> -> vector<8x72xf32>
      %59 = vector.extract_strided_slice %58 {offsets = [0, 0], sizes = [8, 48], strides = [1, 1]} : vector<8x72xf32> to vector<8x48xf32>
      %60 = arith.truncf %59 : vector<8x48xf32> to vector<8x48xbf16>
      %c0_48 = arith.constant 0 : index
      %c0_49 = arith.constant 0 : index
      %61 = vector.load %arg14[%c0_48, %c0_49] : memref<8x48xbf16, #tpu.memory_space<vmem>>, vector<8x48xbf16>
      tpu.vector_store %arg14[%c0_48, %c0_49], %60 {strides = array<i32>} : memref<8x48xbf16, #tpu.memory_space<vmem>>, vector<8x48xbf16>,
      %62 = vector.extract_strided_slice %58 {offsets = [0, 48], sizes = [8, 24], strides = [1, 1]} : vector<8x72xf32> to vector<8x24xf32>
      %63 = arith.truncf %62 : vector<8x24xf32> to vector<8x24xbf16>
      %c0_50 = arith.constant 0 : index
      %c0_51 = arith.constant 0 : index
      %64 = vector.load %arg15[%c0_50, %c0_51] : memref<8x24xbf16, #tpu.memory_space<vmem>>, vector<8x24xbf16>
      tpu.vector_store %arg15[%c0_50, %c0_51], %63 {strides = array<i32>} : memref<8x24xbf16, #tpu.memory_space<vmem>>, vector<8x24xbf16>,
      %65 = vector.broadcast %cst : f32 to vector<1x3xf32>
      %c0_52 = arith.constant 0 : index
      %c0_53 = arith.constant 0 : index
      %66 = vector.load %arg16[%c0_52, %c0_53] : memref<1x3xf32, #tpu.memory_space<vmem>>, vector<1x3xf32>
      tpu.vector_store %arg16[%c0_52, %c0_53], %65 {strides = array<i32>} : memref<1x3xf32, #tpu.memory_space<vmem>>, vector<1x3xf32>,
      %cst_54 = arith.constant 0.000000e+00 : f32
      %67 = vector.broadcast %cst_54 : f32 to vector<8x27xf32>
      %c0_55 = arith.constant 0 : index
      %c0_56 = arith.constant 0 : index
      %68 = vector.load %arg17[%c0_55, %c0_56] : memref<8x27xf32, #tpu.memory_space<vmem>>, vector<8x27xf32>
      tpu.vector_store %arg17[%c0_55, %c0_56], %67 {strides = array<i32>} : memref<8x27xf32, #tpu.memory_space<vmem>>, vector<8x27xf32>,
    } else {
    }
    %c0 = arith.constant 0 : index
    %c0_1 = arith.constant 0 : index
    %3 = vector.load %arg3[%c0, %c0_1] : memref<16x8xbf16, #tpu.memory_space<vmem>>, vector<16x8xbf16>
    %c0_2 = arith.constant 0 : index
    %c0_3 = arith.constant 0 : index
    %4 = vector.load %arg4[%c0_2, %c0_3] : memref<16x8xbf16, #tpu.memory_space<vmem>>, vector<16x8xbf16>
    %c0_4 = arith.constant 0 : index
    %c0_5 = arith.constant 0 : index
    %5 = vector.load %arg10[%c0_4, %c0_5] : memref<3x27xf32, #tpu.memory_space<vmem>>, vector<3x27xf32>
    %c0_6 = arith.constant 0 : index
    %c0_7 = arith.constant 0 : index
    %6 = vector.load %arg14[%c0_6, %c0_7] : memref<8x48xbf16, #tpu.memory_space<vmem>>, vector<8x48xbf16>
    %cst_8 = arith.constant dense<0.000000e+00> : vector<16x48xf32>
    %7 = tpu.matmul %3, %6, %cst_8 {dimension_numbers = #tpu.dot_dimension_numbers<[1], [0], [0], [1], [0, 0, 1, 1], [], []>} : vector<16x8xbf16>, vector<8x48xbf16>, vector<16x48xf32> -> vector<16x48xf32>
    %8 = vector.extract_strided_slice %7 {offsets = [0, 0], sizes = [16, 24], strides = [1, 1]} : vector<16x48xf32> to vector<16x24xf32>
    %9 = vector.extract_strided_slice %7 {offsets = [0, 24], sizes = [16, 24], strides = [1, 1]} : vector<16x48xf32> to vector<16x24xf32>
    %c0_9 = arith.constant 0 : index
    %c0_10 = arith.constant 0 : index
    %10 = vector.load %arg15[%c0_9, %c0_10] : memref<8x24xbf16, #tpu.memory_space<vmem>>, vector<8x24xbf16>
    %cst_11 = arith.constant dense<0.000000e+00> : vector<16x24xf32>
    %11 = tpu.matmul %4, %10, %cst_11 {dimension_numbers = #tpu.dot_dimension_numbers<[1], [0], [0], [1], [0, 0, 1, 1], [], []>} : vector<16x8xbf16>, vector<8x24xbf16>, vector<16x24xf32> -> vector<16x24xf32>
    %c0_12 = arith.constant 0 : index
    %c0_13 = arith.constant 0 : index
    %12 = vector.load %arg2[%c0_12, %c0_13] : memref<16x6xf32, #tpu.memory_space<vmem>>, vector<16x6xf32>
    %c0_14 = arith.constant 0 : index
    %c0_15 = arith.constant 0 : index
    %13 = vector.load %arg6[%c0_14, %c0_15] : memref<6x24xf32, #tpu.memory_space<vmem>>, vector<6x24xf32>
    %cst_16 = arith.constant dense<0.000000e+00> : vector<16x24xf32>
    %14 = tpu.matmul %12, %13, %cst_16 {dimension_numbers = #tpu.dot_dimension_numbers<[1], [0], [0], [1], [0, 0, 1, 1], [], []>} : vector<16x6xf32>, vector<6x24xf32>, vector<16x24xf32> -> vector<16x24xf32>
    %15 = arith.addf %8, %11 : vector<16x24xf32>
    %16 = arith.addf %15, %14 : vector<16x24xf32>
    %c0_17 = arith.constant 0 : index
    %c0_18 = arith.constant 0 : index
    %17 = vector.load %arg7[%c0_17, %c0_18] : memref<1x24xf32, #tpu.memory_space<vmem>>, vector<1x24xf32>
    %18 = vector.broadcast %17 : vector<1x24xf32> to vector<16x24xf32>
    %19 = arith.addf %16, %18 : vector<16x24xf32>
    %cst_19 = arith.constant 0.000000e+00 : f32
    %20 = vector.broadcast %cst_19 : f32 to vector<16x24xf32>
    %21 = arith.cmpf oge, %19, %20 : vector<16x24xf32>
    %cst_20 = arith.constant 0.00999999977 : f32
    %22 = vector.broadcast %cst_20 : f32 to vector<16x24xf32>
    %23 = arith.mulf %22, %19 : vector<16x24xf32>
    %24 = arith.select %21, %19, %23 : vector<16x24xi1>, vector<16x24xf32>
    %c0_21 = arith.constant 0 : index
    %c0_22 = arith.constant 0 : index
    %25 = vector.load %arg9[%c0_21, %c0_22] : memref<8x24xf32, #tpu.memory_space<vmem>>, vector<8x24xf32>
    %cst_23 = arith.constant dense<0.000000e+00> : vector<8x16xf32>
    %26 = tpu.matmul %25, %24, %cst_23 {dimension_numbers = #tpu.dot_dimension_numbers<[1], [1], [0], [0], [0, 0, 1, 0], [], []>} : vector<8x24xf32>, vector<16x24xf32>, vector<8x16xf32> -> vector<8x16xf32>
    %27 = arith.truncf %26 : vector<8x16xf32> to vector<8x16xbf16>
    %c0_24 = arith.constant 0 : index
    %c0_25 = arith.constant 0 : index
    %28 = vector.load %arg13[%c0_24, %c0_25] : memref<8x16xbf16, #tpu.memory_space<vmem>>, vector<8x16xbf16>
    tpu.vector_store %arg13[%c0_24, %c0_25], %27 {strides = array<i32>} : memref<8x16xbf16, #tpu.memory_space<vmem>>, vector<8x16xbf16>,
    %c0_26 = arith.constant 0 : index
    %c0_27 = arith.constant 0 : index
    %29 = vector.load %arg8[%c0_26, %c0_27] : memref<24x3xf32, #tpu.memory_space<vmem>>, vector<24x3xf32>
    %cst_28 = arith.constant dense<0.000000e+00> : vector<16x3xf32>
    %30 = tpu.matmul %24, %29, %cst_28 {dimension_numbers = #tpu.dot_dimension_numbers<[1], [0], [0], [1], [0, 0, 1, 1], [], []>} : vector<16x24xf32>, vector<24x3xf32>, vector<16x3xf32> -> vector<16x3xf32>
    %c0_29 = arith.constant 0 : index
    %c0_30 = arith.constant 0 : index
    %31 = vector.load %arg16[%c0_29, %c0_30] : memref<1x3xf32, #tpu.memory_space<vmem>>, vector<1x3xf32>
    %cst_31 = arith.constant dense<0xFF800000> : vector<3xf32>
    %32 = vector.multi_reduction <maximumf>, %30, %cst_31 [0] : vector<16x3xf32> to vector<3xf32>
    %33 = vector.shape_cast %32 : vector<3xf32> to vector<1x3xf32>
    %34 = arith.maximumf %31, %33 : vector<1x3xf32>
    %c0_32 = arith.constant 0 : index
    %c0_33 = arith.constant 0 : index
    %35 = vector.load %arg16[%c0_32, %c0_33] : memref<1x3xf32, #tpu.memory_space<vmem>>, vector<1x3xf32>
    tpu.vector_store %arg16[%c0_32, %c0_33], %34 {strides = array<i32>} : memref<1x3xf32, #tpu.memory_space<vmem>>, vector<1x3xf32>,
    %36 = arith.subf %31, %34 : vector<1x3xf32>
    %37 = math.exp %36 : vector<1x3xf32>
    %38 = vector.broadcast %34 : vector<1x3xf32> to vector<16x3xf32>
    %39 = arith.subf %30, %38 : vector<16x3xf32>
    %40 = math.exp %39 : vector<16x3xf32>
    %41 = vector.extract_strided_slice %5 {offsets = [0, 0], sizes = [3, 24], strides = [1, 1]} : vector<3x27xf32> to vector<3x24xf32>
    %cst_34 = arith.constant dense<0.000000e+00> : vector<16x24xf32>
    %42 = tpu.matmul %40, %41, %cst_34 {dimension_numbers = #tpu.dot_dimension_numbers<[1], [0], [0], [1], [0, 0, 1, 1], [], []>} : vector<16x3xf32>, vector<3x24xf32>, vector<16x24xf32> -> vector<16x24xf32>
    %43 = arith.mulf %42, %9 : vector<16x24xf32>
    %44 = tpu.concatenate %43, %40 in 1 : vector<16x24xf32>, vector<16x3xf32> -> vector<16x27xf32>
    %45 = arith.truncf %44 : vector<16x27xf32> to vector<16x27xbf16>
    %cst_35 = arith.constant dense<0.000000e+00> : vector<8x27xf32>
    %46 = tpu.matmul %4, %45, %cst_35 {dimension_numbers = #tpu.dot_dimension_numbers<[0], [0], [1], [1], [0, 1, 1, 1], [], []>} : vector<16x8xbf16>, vector<16x27xbf16>, vector<8x27xf32> -> vector<8x27xf32>
    %cst_36 = arith.constant dense<0.000000e+00> : vector<1x27xf32>
    %47 = tpu.matmul %37, %5, %cst_36 {dimension_numbers = #tpu.dot_dimension_numbers<[1], [0], [0], [1], [0, 0, 1, 1], [], []>} : vector<1x3xf32>, vector<3x27xf32>, vector<1x27xf32> -> vector<1x27xf32>
    %c0_37 = arith.constant 0 : index
    %c0_38 = arith.constant 0 : index
    %48 = vector.load %arg17[%c0_37, %c0_38] : memref<8x27xf32, #tpu.memory_space<vmem>>, vector<8x27xf32>
    %49 = vector.broadcast %47 : vector<1x27xf32> to vector<8x27xf32>
    %50 = arith.mulf %48, %49 : vector<8x27xf32>
    %51 = arith.addf %50, %46 : vector<8x27xf32>
    %c0_39 = arith.constant 0 : index
    %c0_40 = arith.constant 0 : index
    %52 = vector.load %arg17[%c0_39, %c0_40] : memref<8x27xf32, #tpu.memory_space<vmem>>, vector<8x27xf32>
    tpu.vector_store %arg17[%c0_39, %c0_40], %51 {strides = array<i32>} : memref<8x27xf32, #tpu.memory_space<vmem>>, vector<8x27xf32>,
    %c0_i32_41 = arith.constant 0 : i32
    %53 = arith.cmpi eq, %arg0, %c0_i32_41 : i32
    %54 = arith.extui %53 : i1 to i32
    %c0_i32_42 = arith.constant 0 : i32
    %55 = arith.cmpi ne, %54, %c0_i32_42 : i32
    scf.if %55 {
      %c0_43 = arith.constant 0 : index
      %c0_44 = arith.constant 0 : index
      %56 = vector.load %arg17[%c0_43, %c0_44] : memref<8x27xf32, #tpu.memory_space<vmem>>, vector<8x27xf32>
      %57 = vector.extract_strided_slice %56 {offsets = [0, 0], sizes = [8, 24], strides = [1, 1]} : vector<8x27xf32> to vector<8x24xf32>
      %58 = vector.extract_strided_slice %56 {offsets = [0, 24], sizes = [8, 3], strides = [1, 1]} : vector<8x27xf32> to vector<8x3xf32>
      %cst_45 = arith.constant 0.000000e+00 : f32
      %59 = vector.broadcast %cst_45 : f32 to vector<8x3xf32>
      %60 = arith.cmpf ogt, %58, %59 : vector<8x3xf32>
      %cst_46 = arith.constant 1.000000e+00 : f32
      %61 = vector.broadcast %cst_46 : f32 to vector<8x3xf32>
      %62 = arith.select %60, %58, %61 : vector<8x3xi1>, vector<8x3xf32>
      %63 = tpu.reciprocal %62 {approx = true} : vector<8x3xf32> -> vector<8x3xf32>
      %c0_47 = arith.constant 0 : index
      %c0_48 = arith.constant 0 : index
      %64 = vector.load %arg10[%c0_47, %c0_48] : memref<3x27xf32, #tpu.memory_space<vmem>>, vector<3x27xf32>
      %65 = vector.extract_strided_slice %64 {offsets = [0, 0], sizes = [3, 24], strides = [1, 1]} : vector<3x27xf32> to vector<3x24xf32>
      %cst_49 = arith.constant dense<0.000000e+00> : vector<8x24xf32>
      %66 = tpu.matmul %63, %65, %cst_49 {dimension_numbers = #tpu.dot_dimension_numbers<[1], [0], [0], [1], [0, 0, 1, 1], [], []>} : vector<8x3xf32>, vector<3x24xf32>, vector<8x24xf32> -> vector<8x24xf32>
      %67 = arith.mulf %57, %66 : vector<8x24xf32>
      %c0_50 = arith.constant 0 : index
      %c0_51 = arith.constant 0 : index
      %68 = vector.load %arg11[%c0_50, %c0_51] : memref<24x8xf32, #tpu.memory_space<vmem>>, vector<24x8xf32>
      %cst_52 = arith.constant dense<0.000000e+00> : vector<8x8xf32>
      %69 = tpu.matmul %67, %68, %cst_52 {dimension_numbers = #tpu.dot_dimension_numbers<[1], [0], [0], [1], [0, 0, 1, 1], [], []>} : vector<8x24xf32>, vector<24x8xf32>, vector<8x8xf32> -> vector<8x8xf32>
      %70 = arith.truncf %69 : vector<8x8xf32> to vector<8x8xbf16>
      %c0_53 = arith.constant 0 : index
      %c0_54 = arith.constant 0 : index
      %71 = vector.load %arg12[%c0_53, %c0_54] : memref<8x8xbf16, #tpu.memory_space<vmem>>, vector<8x8xbf16>
      tpu.vector_store %arg12[%c0_53, %c0_54], %70 {strides = array<i32>} : memref<8x8xbf16, #tpu.memory_space<vmem>>, vector<8x8xbf16>,
    } else {
    }
    return
  }
  func.func @transform_0(%arg0: i32) -> (i32, i32) {
    %c0_i32 = arith.constant 0 : i32
    %c0_i32_0 = arith.constant 0 : i32
    %c0_i32_1 = arith.constant 0 : i32
    return %c0_i32, %c0_i32_0 : i32, i32
  }
  func.func @transform_1(%arg0: i32) -> (i32, i32) {
    %c0_i32 = arith.constant 0 : i32
    %c0_i32_0 = arith.constant 0 : i32
    return %arg0, %c0_i32 : i32, i32
  }
  func.func @transform_2(%arg0: i32) -> (i32, i32) {
    %c0_i32 = arith.constant 0 : i32
    %c0_i32_0 = arith.constant 0 : i32
    return %arg0, %c0_i32 : i32, i32
  }
  func.func @transform_3(%arg0: i32) -> (i32, i32) {
    %c0_i32 = arith.constant 0 : i32
    %c0_i32_0 = arith.constant 0 : i32
    return %arg0, %c0_i32 : i32, i32
  }
  func.func @transform_4(%arg0: i32) -> (i32, i32) {
    %c0_i32 = arith.constant 0 : i32
    %c0_i32_0 = arith.constant 0 : i32
    %c0_i32_1 = arith.constant 0 : i32
    return %c0_i32, %c0_i32_0 : i32, i32
  }
  func.func @transform_5(%arg0: i32) -> (i32, i32) {
    %c0_i32 = arith.constant 0 : i32
    %c0_i32_0 = arith.constant 0 : i32
    %c0_i32_1 = arith.constant 0 : i32
    return %c0_i32, %c0_i32_0 : i32, i32
  }
  func.func @transform_6(%arg0: i32) -> (i32, i32) {
    %c0_i32 = arith.constant 0 : i32
    %c0_i32_0 = arith.constant 0 : i32
    %c0_i32_1 = arith.constant 0 : i32
    return %c0_i32, %c0_i32_0 : i32, i32
  }
  func.func @transform_7(%arg0: i32) -> (i32, i32) {
    %c0_i32 = arith.constant 0 : i32
    %c0_i32_0 = arith.constant 0 : i32
    %c0_i32_1 = arith.constant 0 : i32
    return %c0_i32, %c0_i32_0 : i32, i32
  }
  func.func @transform_8(%arg0: i32) -> (i32, i32) {
    %c0_i32 = arith.constant 0 : i32
    %c0_i32_0 = arith.constant 0 : i32
    %c0_i32_1 = arith.constant 0 : i32
    return %c0_i32, %c0_i32_0 : i32, i32
  }
  func.func @transform_9(%arg0: i32) -> (i32, i32) {
    %c0_i32 = arith.constant 0 : i32
    %c0_i32_0 = arith.constant 0 : i32
    %c0_i32_1 = arith.constant 0 : i32
    return %c0_i32, %c0_i32_0 : i32, i32
  }
  func.func @transform_10(%arg0: i32) -> (i32, i32) {
    %c0_i32 = arith.constant 0 : i32
    %c0_i32_0 = arith.constant 0 : i32
    %c0_i32_1 = arith.constant 0 : i32
    return %c0_i32, %c0_i32_0 : i32, i32
  }
  func.func @transform_11(%arg0: i32) -> (i32, i32) {
    %c0_i32 = arith.constant 0 : i32
    %c0_i32_0 = arith.constant 0 : i32
    %c0_i32_1 = arith.constant 0 : i32
    return %c0_i32, %c0_i32_0 : i32, i32
  }
  func.func @transform_12(%arg0: i32) -> (i32, i32) {
    %c0_i32 = arith.constant 0 : i32
    %c0_i32_0 = arith.constant 0 : i32
    return %c0_i32, %arg0 : i32, i32
  }
}

</mosaic_0001>

<bundles_post_ra>
// kernel: tpu_custom_call.1
= control target key start
LH: loop header
LB: loop body
LE: loop exit
PB: predicated region body
PF: predicated region fallthrough
CT: control target
= control target key end

     0   :  { %18 = vsyncpa [#allocation7], 0  ;;  %vm53_vm0 = vcmask 1043456   ;;  %v1203_v2 = vmov 0.0   ;;  %vm1204_vm1 = vmmov 0   ;;  %vm49_vm2 = vcmask 31744   ;;  %s1408_s0 = inlined_call_operand.vmem [shape: f32[8,4], index: 0, kind: input, shape index: {}]   ;;  %s1409_s1 = inlined_call_operand.vmem [shape: f32[16,6], index: 1, kind: input, shape index: {}]   ;;  %s1410_s2 = inlined_call_operand.vmem [shape: bf16[16,8], index: 2, kind: input, shape index: {}]   ;;  %s1411_s3 = inlined_call_operand.vmem [shape: bf16[16,8], index: 3, kind: input, shape index: {}]   ;;  %s1412_s4 = inlined_call_operand.vmem [shape: f32[4,72], index: 4, kind: input, shape index: {}]   ;;  %s1413_s5 = inlined_call_operand.vmem [shape: f32[6,24], index: 5, kind: input, shape index: {}]   ;;  %s1414_s6 = inlined_call_operand.vmem [shape: f32[1,24], index: 6, kind: input, shape index: {}]   ;;  %s1415_s7 = inlined_call_operand.vmem [shape: f32[24,3], index: 7, kind: input, shape index: {}]   ;;  %s1416_s8 = inlined_call_operand.vmem [shape: f32[8,24], index: 8, kind: input, shape index: {}]   ;;  %s1417_s9 = inlined_call_operand.vmem [shape: f32[3,27], index: 9, kind: input, shape index: {}]   ;;  %s1418_s10 = inlined_call_operand.vmem [shape: f32[24,8], index: 10, kind: input, shape index: {}]   ;;  %s1419_s11 = inlined_call_operand.hbm [shape: bf16[8,8], index: 11, kind: output, shape index: {0}]   ;;  %s1420_s12 = inlined_call_operand.hbm [shape: bf16[8,16], index: 12, kind: output, shape index: {1}]  }
   0x1   :  { %v48_v0 = vld [vmem:[%s1412_s4] sm:$0xf]  ;;  %1051 = vmatprep.subr.mxu1 %v1203_v2  ;;  %1053 = vmatprep.mubr.msk.f32.mxu1 %vm1204_vm1, %v1203_v2 }
   0x2   :  { %v47_v1 = vld [vmem:[%s1408_s0] sm:$0xff]  ;;  %1052 = vmatpush3.msk.msra.mxu1 %vm53_vm0, %v48_v0  ;;  %1062 = vmatprep.subr.bf16.mxu0 %v1203_v2 }
   0x3   :  { %19 = vsyncpa [#allocation9], 0  ;;  %1054 = vmatmul.mubr.msk.f32.vlgmr.msra.gmra.mrb[0].mxu1 %vm49_vm2, %v47_v1  ;;  %1056 = vmatprep.subr.bf16.mxu1 %v1203_v2  ;;  %vm128_vm3 = vcmask 388096   ;;  %s1205_s0 = smov 80   ;;  %v257_v7 = vld [vmem:[%s1413_s5] sm:$0x3f]  ;;  %v543_v53 = vlaneseq }
   0x4   :  { %1058 = vmatprep.mubr.msk.bf16.mxu1 %vm1204_vm1, %v1203_v2  ;;  %1064 = vmatprep.mubr.msk.bf16.mxu0 %vm1204_vm1, %v1203_v2  ;;  %vm265_vm4 = vcmask 1045504   ;;  %v1145_v9 = vld [vmem:[%s1410_s2] sm:$0xff]   ;;  %vm153_vm5 = vcmask 64512   ;;  %vm258_vm6 = vcmask 48128   ;;  %v256_v11 = vld [vmem:[%s1409_s1 + $0x8] sm:$0xff]  ;;  %vm136_vm7 = vcmask 191488  }
   0x5   :  { %v255_v10 = vld [vmem:[%s1409_s1] sm:$0xff]  ;;  %v448_v17 = vld [vmem:[%s1415_s7 + $0x8] sm:$0xff]  ;;  %v449_v19 = vld [vmem:[%s1415_s7 + $0x10] sm:$0xff]  ;;  %v1206_v21 = vmov 0.0|0.0   ;;  %vm364_vm9 = vcmask 195584   ;;  %vm138_vm12 = vcmask 16384  }
   0x6   :  { %v1146_v15 = vld [vmem:[%s1411_s3] sm:$0xff]   ;;  %s1207_s3 = smov 104   ;;  %vm1121_vm11 = vmpackc.low %vm364_vm9, %vm364_vm9  ;;  %v1208_v43 = vmov -1e+30   ;;  %vm560_vm13 = vcmask 1042432   ;;  %vm526_vm14 = vcmask 23552  }
   0x7   :  { %v447_v16 = vld [vmem:[%s1415_s7] sm:$0xff]  ;;  %139 = vst.msk [vmem:[#allocation4] sm:$0x1] %vm138_vm12, %v1208_v43  ;;  %v544_v56 = vshrl.u32 %v543_v53, 7  ;;  %vm140_vm15 = vcmask 220160   ;;  %vm675_vm2 = vcmask 130048  }
   0x8   :  { %v1123_v18 = vpack.c.bf16 %v448_v17, %v447_v16  ;;  %v1005_v31 = vld [vmem:[%s1414_s6] ss:$0 sm:$0xff]  ;;  %141 = vst.msk [vmem:[#allocation5] sm:$0xff] %vm140_vm15, %v1203_v2  ;;  %s1210_s28 = smov [#allocation8]  }
   0x9   :  { %v363_v44 = vld [vmem:[%s1416_s8] sm:$0xff]  ;;  %v545_v60 = vsub.s32 0, %v544_v56  ;;  %s1209_s8 = smov 24   ;;  %s983_s29 = sshll.u32 %s1210_s28, 4  ;;  %s984_s29 = int_to_ptr.vmem [resolvable:$true] %s983_s29 }
   0xa   :  { %v146_v45 = vld [vmem:[%s1417_s9] sm:$0x7]  ;;  %s1155_s5 = scalar_lea.vmem %s984_s29, 64  ;;  %p1160_p1 = scmp.lt.s32.totalorder %s984_s29, %s984_s29 }
   0xb   :  { %p1156_p0 = scmp.ne.s32.totalorder %s984_s29, %s1155_s5  ;;  %p1161_p2 = scmp.lt.s32.totalorder %s1155_s5, %s1155_s5 }
   0xd   :  { %p1162_p3 = por %p1161_p2, %p1160_p1 }
   0xe   :  { %v525_v58 = vld [vmem:[#allocation4] sm:$0x1] }
   0xf   :  { %p1163_p4 = pnand %p1162_p3, %p1156_p0 }
  0xd6   :  { %v123_v3 = vpop.f32.mrb[0].mxu1 }
  0xd7   :  { %v127_v4 = vpack.c.bf16 %v123_v3, %v123_v3  ;;  %v1055_v5 = vpop.f32.mrb[1].mxu1 }
  0xd9   :  { %129 = vst.msk [vmem:[#allocation2] sm:$0xf] %vm128_vm3, %v127_v4  ;;  %133 = vrot.lane.b32.xlu0 %v127_v4, %s1205_s0 }
  0xe0   :  { %v147_v6 = vld [vmem:[#allocation2] sm:$0xf] }
  0xe1   :  { %v159_v8 = vsel %vm53_vm0, %v147_v6, 0 }
  0xe2   :  { %1057 = vmatpush3.bf16.msra.mxu1 %v159_v8 }
  0xe3   :  { %1068 = vmatprep.subr.msk.mxu1 %vm265_vm4, %v257_v7 }
  0xe5   :  { %1059 = vmatmul.mubr.msk.bf16.vlgmr.msra.gmra.mrb[4].mxu1 %vm153_vm5, %v1145_v9 }
  0xe6   :  { %1069 = vmatpush3.msk.msra.mxu1 %vm265_vm4, %v257_v7  ;;  %1070 = vmatprep.mubr.msk.f32.mxu1 %vm258_vm6, %v255_v10 }
  0xe7   :  { %1124 = vmatprep.subr.bf16.mxu1 %v1123_v18 }
  0xed   :  { %1071 = vmatmul.mubr.msk.f32.vlgmr.msra.gmra.mrb[2].mxu1 %vm258_vm6, %v256_v11 }
  0xee   :  { %1126 = vmatpush3.bf16.msra.mxu1 %v1123_v18 }
  0xef   :  { %1084 = vmatprep.subr.mxu1 %v449_v19 }
  0xf2   :  { %1085 = vmatpush3.msra.mxu1 %v449_v19 }
  0xf3   :  { %1100 = vmatprep.subr.mxu1 %v1203_v2 }
 0x14b   :  { %v134_v12 = vpop.permute.xlu0 %133 }
 0x14c   :  { %137 = vst.msk [vmem:[#allocation3] sm:$0xf] %vm136_vm7, %v134_v12 }
 0x153   :  { %v202_v13 = vld [vmem:[#allocation3] sm:$0xf] }
 0x154   :  { %v212_v14 = vsel %vm53_vm0, %v202_v13, 0  ;;  %vm445_vm0 = vcmask 125952  }
 0x155   :  { %1063 = vmatpush3.bf16.msra.mxu0 %v212_v14 }
 0x156   :  { %1119 = vmatprep.subr.bf16.mxu0 %v1206_v21 }
 0x158   :  { %1065 = vmatmul.mubr.msk.bf16.vlgmr.msra.gmra.mrb[0].mxu0 %vm153_vm5, %v1146_v15 }
 0x159   :  { %1077 = vmatprep.mubr.msk.f32.mxu0 %vm1204_vm1, %v1203_v2 }
 0x1b8   :  { %v195_v20 = vpop.f32.mrb[4].mxu1 }
 0x1b9   :  { %v1060_v22 = vpop.f32.mrb[5].mxu1  ;;  %641 = vrot.lane.b32.xlu0 %v195_v20, %s1207_s3 }
 0x1ba   :  { %v198_v23 = vpop.f32.mrb[6].mxu1 }
 0x1bb   :  { %v1061_v24 = vpop.f32.mrb[7].mxu1  ;;  %643 = vrot.lane.b32.xlu1 %v198_v23, %s1207_s3 }
 0x1c0   :  { %v1072_v25 = vpop.f32.mrb[2].mxu1 }
 0x1c1   :  { %v335_v26 = vpop.f32.mrb[3].mxu1 }
 0x1d7   :  { %659 = vxpose.xlu0.c.b16.start.end [1/1] (short) (narrow) %v1146_v15, 16 }
 0x22b   :  { %v248_v27 = vpop.f32.mrb[0].mxu0  ;;  %v642_v18 = vpop.permute.xlu0 %641 }
 0x22c   :  { %v344_v28 = vadd.f32 %v248_v27, %v195_v20  ;;  %v1066_v29 = vpop.f32.mrb[1].mxu0 }
 0x22d   :  { %v251_v30 = vpop.f32.mrb[2].mxu0  ;;  %v644_v13 = vpop.permute.xlu1 %643  ;;  %v808_v29 = vld [vmem:[%s1417_s9] sm:$0x7] }
 0x22e   :  { %v345_v32 = vadd.f32 %v251_v30, %v198_v23  ;;  %v346_v33 = vadd.f32 %v344_v28, %v335_v26  ;;  %v1067_v34 = vpop.f32.mrb[3].mxu0 }
 0x230   :  { %v347_v35 = vadd.f32 %v1072_v25, %v345_v32  ;;  %v355_v36 = vadd.f32 %v1005_v31, %v346_v33 }
 0x232   :  { %v356_v37 = vadd.f32 %v1005_v31, %v347_v35  ;;  %v359_v38 = vmul.f32 0.01, %v355_v36  ;;  %vm357_vm8 = vcmp.ge.f32.partialorder %v355_v36, 0.0  ;;  %v792_v31 = vld [vmem:[#allocation5] sm:$0xff] }
 0x234   :  { %v360_v39 = vmul.f32 0.01, %v356_v37  ;;  %vm358_vm10 = vcmp.ge.f32.partialorder %v356_v37, 0.0  ;;  %v361_v40 = vsel %vm357_vm8, %v355_v36, %v359_v38  ;;  %v888_v38 = vld [vmem:[%s1418_s10] sm:$0xff] }
 0x235   :  { %1086 = vmatprep.mubr.msk.f32.mxu1 %vm364_vm9, %v361_v40 }
 0x236   :  { %v362_v41 = vsel %vm358_vm10, %v356_v37, %v360_v39  ;;  %v889_v39 = vld [vmem:[%s1418_s10 + $0x8] sm:$0xff] }
 0x237   :  { %v1120_v42 = vpack.c.bf16 %v362_v41, %v361_v40  ;;  %1087 = vmatmul.mubr.msk.f32.vlgmr.msra.gmra.mrb[8].mxu1 %vm364_vm9, %v362_v41  ;;  %v1128_v41 = vpack.c.bf16 %v889_v39, %v888_v38 }
 0x238   :  { %1102 = vmatprep.mubr.msk.f32.mxu1 %vm1204_vm1, %v1203_v2  ;;  %1101 = vmatpush3.msk.msra.mxu1 %vm560_vm13, %v146_v45 }
 0x239   :  { %1122 = vmatpush3.bf16.xpose.msk.msra.mxu0 %vm1121_vm11, %v1120_v42  ;;  %1105 = vmatprep.subr.mxu1 %v1203_v2 }
 0x23a   :  { %1089 = vmatprep.subr.msk.mxu0 %vm560_vm13, %v146_v45 }
 0x23d   :  { %v667_v28 = vpop.trf.xlu0 }
 0x240   :  { %1078 = vmatmul.mubr.msk.f32.vlgmr.msra.gmra.mrb[4].mxu0 %vm364_vm9, %v363_v44  ;;  %v890_v44 = vld [vmem:[%s1418_s10 + $0x10] sm:$0xff] }
 0x241   :  { %1090 = vmatpush3.msk.msra.mxu0 %vm560_vm13, %v146_v45 }
 0x242   :  { %1094 = vmatprep.subr.bf16.mxu0 %v1203_v2 }
 0x30a   :  { %v1088_v46 = vpop.f32.mrb[8].mxu1 }
 0x30b   :  { %v528_v47 = vsel %vm526_vm14, %v1088_v46, -inf  ;;  %v516_v48 = vpop.f32.mrb[9].mxu1 }
 0x30c   :  { %v527_v49 = vsel %vm526_vm14, %v516_v48, -inf }
 0x30d   :  { %v529_v50 = vmax.f32 %v527_v49, %v528_v47 }
 0x30f   :  { %v530_v51 = vrot.slane %v529_v50, 4 }
 0x311   :  { %v531_v52 = vmax.f32 %v529_v50, %v530_v51 }
 0x313   :  { %v532_v54 = vrot.slane %v531_v52, 2  ;;  %v440_v10 = vpop.f32.mrb[4].mxu0 }
 0x314   :  { %v1079_v11 = vpop.f32.mrb[5].mxu0  ;;  %v444_v12 = vpack.c.bf16 %v440_v10, %v440_v10 }
 0x315   :  { %v533_v55 = vmax.f32 %v531_v52, %v532_v54 }
 0x316   :  { %446 = vst.msk [vmem:[#allocation8] sm:$0xf] %vm445_vm0, %v444_v12 }
 0x317   :  { %v534_v57 = vrot.slane %v533_v55, 1 }
 0x319   :  { %v535_v59 = vmax.f32 %v533_v55, %v534_v57 }
 0x31b   :  { %v536_v61 = vmax.f32 %v525_v58, %v535_v59 }
 0x31d   :  { %538 = vst.msk [vmem:[#allocation4] sm:$0x1] %vm138_vm12, %v536_v61  ;;  %v539_v62 = vsub.f32 %v525_v58, %v536_v61  ;;  %v546_v63 = vrot.slane %v536_v61, %v545_v60 }
 0x31f   :  { %v540_v0 = vmul.f32 1.442695, %v539_v62  ;;  %v548_v1 = vsub.f32 %v516_v48, %v546_v63  ;;  %v549_v3 = vsub.f32 %v1088_v46, %v546_v63 }
 0x321   :  { %1147 = vpow2.f32 %v540_v0  ;;  %v550_v4 = vmul.f32 1.442695, %v548_v1  ;;  %v552_v5 = vmul.f32 1.442695, %v549_v3 }
 0x323   :  { %1149 = vpow2.f32 %v550_v4 }
 0x324   :  { %1151 = vpow2.f32 %v552_v5 }
 0x32b   :  { %v1148_v6 = vpop.eup %1147 }
 0x32c   :  { %1103 = vmatmul.mubr.msk.f32.vlgmr.msra.gmra.mrb[10].mxu1 %vm526_vm14, %v1148_v6 }
 0x32d   :  { %v1150_v7 = vpop.eup %1149  ;;  %1107 = vmatprep.mubr.msk.f32.mxu1 %vm1204_vm1, %v1203_v2  ;;  %1106 = vmatpush3.msk.msra.mxu1 %vm560_vm13, %v808_v29 }
 0x32e   :  { %v1152_v8 = vpop.eup %1151  ;;  %1091 = vmatprep.mubr.msk.f32.mxu0 %vm526_vm14, %v1150_v7 }
 0x32f   :  { %1092 = vmatmul.mubr.msk.f32.vlgmr.msra.gmra.mrb[6].mxu0 %vm526_vm14, %v1152_v8  ;;  %v1140_v9 = vpack.i.bf16 %v1152_v8, %v1150_v7 }
 0x330   :  { %1096 = vmatprep.mubr.msk.bf16.mxu0 %vm1204_vm1, %v1203_v2 }
 0x331   :  { %1141 = vrot.lane.b32.xlu1 %v1140_v9, %s1209_s8 }
 0x3a3   :  { %v1142_v15 = vpop.permute.xlu1 %1141 }
 0x3a4   :  { %v1144_v19 = vunpack.i.h.bf16 %v1142_v15  ;;  %v1143_v23 = vunpack.i.l.bf16 %v1142_v15 }
 0x3ff   :  { %v788_v14 = vpop.f32.mrb[10].mxu1 }
 0x400   :  { %v1104_v16 = vpop.f32.mrb[11].mxu1  ;;  %v796_v30 = vrot.slane %v788_v14, %v545_v60 }
 0x402   :  { %v1093_v17 = vpop.f32.mrb[6].mxu0  ;;  %v797_v32 = vmul.f32 %v796_v30, %v792_v31 }
 0x403   :  { %v648_v20 = vmul.f32 %v1093_v17, %v644_v13  ;;  %v630_v22 = vpop.f32.mrb[7].mxu0 }
 0x404   :  { %v647_v24 = vmul.f32 %v642_v18, %v630_v22 }
 0x405   :  { %v656_v25 = vsel %vm364_vm9, %v648_v20, %v1144_v19 }
 0x406   :  { %v655_v26 = vsel %vm364_vm9, %v647_v24, %v1143_v23 }
 0x407   :  { %v657_v27 = vpack.c.bf16 %v656_v25, %v655_v26 }
 0x409   :  { %1095 = vmatpush3.bf16.msra.mxu0 %v657_v27 }
 0x40a   :  { %1127 = vmatprep.subr.bf16.mxu0 %v1206_v21 }
 0x40c   :  { %1097 = vmatmul.mubr.msk.bf16.vlgmr.msra.gmra.mrb[8].mxu0 %vm675_vm2, %v667_v28 }
 0x40d   :  { %1116 = vmatprep.mubr.msk.f32.mxu0 %vm1204_vm1, %v1203_v2  ;;  %1129 = vmatpush3.bf16.msra.mxu0 %v1128_v41 }
 0x40e   :  { %1114 = vmatprep.subr.mxu0 %v1203_v2 }
 0x411   :  { %1115 = vmatpush3.msra.mxu0 %v890_v44 }
 0x4df   :  { %v713_v33 = vpop.f32.mrb[8].mxu0 }
 0x4e0   :  { %v798_v34 = vadd.f32 %v797_v32, %v713_v33  ;;  %v1098_v35 = vpop.f32.mrb[9].mxu0 }
 0x4e1   :  { %v716_v36 = vpop.f32.mrb[10].mxu0 }
 0x4e2   :  { %800 = vst.msk [vmem:[#allocation5] sm:$0xff] %vm140_vm15, %v798_v34  ;;  %v1099_v21 = vpop.f32.mrb[11].mxu0 }
 0x4e9   :  { %v804_v37 = vld [vmem:[#allocation5] sm:$0xff] }
 0x4ea   :  { %vm805_vm3 = vcmp.gt.f32.partialorder %v804_v37, 0.0 }
 0x4eb   :  { %v806_v40 = vsel %vm805_vm3, %v804_v37, 1.0 }
 0x4ec   :  { %1153 = vrcp.f32 %v806_v40 }
 0x4f6   :  { %v1154_v42 = vpop.eup %1153 }
 0x4f7   :  { %810 = vrot.lane.b32.xlu1 %v1154_v42, %s1207_s3 }
 0x569   :  { %v811_v43 = vpop.permute.xlu1 %810 }
 0x56a   :  { %1108 = vmatmul.mubr.msk.f32.vlgmr.msra.gmra.mrb[12].mxu1 %vm526_vm14, %v811_v43 }
 0x63d   :  { %v883_v45 = vpop.f32.mrb[12].mxu1 }
 0x63e   :  { %v887_v46 = vmul.f32 %v883_v45, %v804_v37  ;;  %v1109_v47 = vpop.f32.mrb[13].mxu1 }
 0x640   :  { %1117 = vmatmul.mubr.msk.f32.vlgmr.msra.gmra.mrb[12].mxu0 %vm364_vm9, %v887_v46 }
 0x641   :  { %1166 = shalt.err (!%p1163_p4)
}
 0x642   :  { %s1167_s10 = scalar_lea.hbm %s1420_s12, 64 }
 0x643   :  { %p1168_p5 = scmp.ne.s32.totalorder %s1420_s12, %s1167_s10  ;;  %p1171_p6 = scmp.lt.u32.totalorder %s1167_s10, %s1420_s12 }
 0x645   :  { %p1173_p7 = pnand %p1171_p6, %p1168_p5 }
 0x647   :  { %1176 = shalt.err (!%p1173_p7)
}
 0x648   :  { %986 = dma.vmem_to_hbm [thread:$0]  %s984_s29, 64, %s1420_s12, [#allocation9]   ;;  %vm965_vm1 = vcmask 60416  }
 0x649   :  { %s1211_s18 = smov [#allocation6]  }
 0x64a   :  { %s973_s3 = sshll.u32 %s1211_s18, 4  ;;  %s974_s3 = int_to_ptr.vmem [resolvable:$true] %s973_s3 }
 0x64b   :  { %s1177_s7 = scalar_lea.vmem %s974_s3, 64  ;;  %p1182_p9 = scmp.lt.s32.totalorder %s974_s3, %s974_s3 }
 0x64c   :  { %p1178_p8 = scmp.ne.s32.totalorder %s974_s3, %s1177_s7  ;;  %p1183_p10 = scmp.lt.s32.totalorder %s1177_s7, %s1177_s7 }
 0x64e   :  { %p1184_p11 = por %p1183_p10, %p1182_p9 }
 0x650   :  { %p1185_p12 = pnand %p1184_p11, %p1178_p8 }
 0x713   :  { %v960_v2 = vpop.f32.mrb[12].mxu0 }
 0x714   :  { %v964_v48 = vpack.c.bf16 %v960_v2, %v960_v2  ;;  %v1118_v49 = vpop.f32.mrb[13].mxu0 }
 0x716   :  { %966 = vst.msk [vmem:[#allocation6] sm:$0xf] %vm965_vm1, %v964_v48 }
 0x717   :  { %1188 = shalt.err (!%p1185_p12)
}
 0x718   :  { %s1189_s20 = scalar_lea.hbm %s1419_s11, 64 }
 0x719   :  { %p1190_p13 = scmp.ne.s32.totalorder %s1419_s11, %s1189_s20  ;;  %p1193_p0 = scmp.lt.u32.totalorder %s1189_s20, %s1419_s11 }
 0x71b   :  { %p1195_p1 = pnand %p1193_p0, %p1190_p13 }
 0x71d   :  { %1198 = shalt.err (!%p1195_p1)
}
 0x71e   :  { %976 = dma.vmem_to_hbm [thread:$0]  %s974_s3, 64, %s1419_s11, [#allocation7]  }
 0x71f   :  { %1199 = dma.done.wait [#allocation7], 64  }
 0x720   :  { %1200 = vsyncadd [#allocation7], 4294967232 }
 0x721   :  { %1201 = dma.done.wait [#allocation9], 64  }
 0x722   :  { %1202 = vsyncadd [#allocation9], 4294967232 }
 0x723   :  { %993 = vsyncpa [#allocation7], 1 }
 0x724   :  { %994 = vsyncpa [#allocation9], 1 }

</bundles_post_ra>
